<compile_context>
chip_gen: v5e
topology: v5e:2x2
jax: 0.10.0
libtpu: 0.0.40
codegen_flags: <defaults>
</compile_context>

<pallas_src>
import math

import jax
import jax.numpy as jnp
from jax.experimental import pallas as pl
from jax.experimental.pallas import tpu as pltpu


def _round_up(x, m):
    return (x + m - 1) // m * m


def _cdiv(a, b):
    return (a + b - 1) // b


def _vmem_capacity_bytes():
    """Per-TensorCore VMEM capacity; conservative fallback if query fails."""
    try:
        return int(pltpu.get_tpu_info().vmem_capacity_bytes)
    except Exception:
        return 64 << 20  # v7x per-TC VMEM (smallest of v5e/v6e/v7x)


# ---------------------------------------------------------------------------
# One-time weight repack (do this at weight-load time, NOT per forward call).
# ---------------------------------------------------------------------------
def pack_ffn_weights(w1, w3, w2, *, tile_h=512, dtype=jnp.bfloat16):
    """Repack FFN weights into bf16, block-contiguous slabs.

    w1, w3 : (D, H)   (transpose of nn.Linear(dim, hidden).weight)
    w2     : (H, D)   (transpose of nn.Linear(hidden, dim).weight)

    Returns:
      w13_blocks : (n_h, D, 2*tile_h)  block h = [w1[:, h-slice] | w3[:, h-slice]]
      w2_blocks  : (n_h, tile_h, D)
    """
    D, H = w1.shape
    assert w3.shape == (D, H) and w2.shape == (H, D)

    # Largest multiple-of-128 divisor of H that is <= tile_h (else full H).
    th = 0
    start = (min(tile_h, H) // 128) * 128
    for cand in range(start, 0, -128):
        if H % cand == 0:
            th = cand
            break
    if th == 0:
        th = H
    n_h = H // th

    w1b = w1.astype(dtype).reshape(D, n_h, th)
    w3b = w3.astype(dtype).reshape(D, n_h, th)
    # (n_h, D, 2*th): each hidden block is one dense contiguous slab in HBM.
    w13_blocks = jnp.concatenate([w1b, w3b], axis=2).transpose(1, 0, 2)
    w2_blocks = w2.astype(dtype).reshape(n_h, th, D)
    return w13_blocks, w2_blocks


# ---------------------------------------------------------------------------
# Kernel
# ---------------------------------------------------------------------------
def _swiglu_ffn_kernel(x_ref, w13_ref, w2_ref, o_ref, acc_ref):
    """One (tile_m, D) output block; grid axis 1 walks the hidden reduction."""
    h = pl.program_id(1)

    @pl.when(h == 0)
    def _():
        acc_ref[...] = jnp.zeros_like(acc_ref)

    tile_h = w2_ref.shape[0]
    # Single fused MXU pass over [w1_h | w3_h]  (bf16 in, fp32 accumulate).
    ab = jnp.dot(x_ref[...], w13_ref[...],
                 preferred_element_type=jnp.float32)          # (tm, 2*th) fp32
    a = ab[:, :tile_h]                                        # w1 half
    b = ab[:, tile_h:]                                        # w3 half
    # SiLU: exp + approx reciprocal both issue on the EUP slot (off VALU path).
    s = pl.reciprocal(1.0 + jnp.exp(-a), approx=True)
    gated = (a * s) * b                                       # (tm, th) fp32
    acc_ref[...] += jnp.dot(gated.astype(w2_ref.dtype), w2_ref[...],
                            preferred_element_type=jnp.float32)  # (tm, D)

    @pl.when(h == pl.num_programs(1) - 1)
    def _():
        o_ref[...] = acc_ref[...].astype(o_ref.dtype)


# ---------------------------------------------------------------------------
# Wrapper
# ---------------------------------------------------------------------------
def swiglu_ffn(x, w13_blocks, w2_blocks, *, tile_m=None, vmem_limit_bytes=None):
    """SwiGLU FFN:  w2( silu(x@w1) * (x@w3) )  with pre-packed weights.

    x          : (..., D)  (any float dtype; matmuls run in the packed dtype)
    w13_blocks : (n_h, D, 2*tile_h)  from pack_ffn_weights
    w2_blocks  : (n_h, tile_h, D)
    """
    orig_shape = x.shape
    D = orig_shape[-1]
    n_h, tile_h, D2 = w2_blocks.shape
    assert D2 == D and w13_blocks.shape == (n_h, D, 2 * tile_h)
    H = n_h * tile_h
    compute_dtype = w13_blocks.dtype

    x2d = x.reshape(-1, D)
    M = x2d.shape[0]

    vmem_cap = _vmem_capacity_bytes()
    if tile_m is None:
        # Bigger M tiles on 128-MiB chips (v5e/v6e); cap at 512 on v7x (64 MiB).
        tile_m = 512 if vmem_cap <= (64 << 20) else 1024
    tile_m_eff = min(tile_m, _round_up(M, 8))
    # Megacore (v7x): if everything fits in one M tile but M is large, split in
    # two so the "parallel" M axis can shard across both TensorCores.
    if M > 256 and _cdiv(M, tile_m_eff) == 1:
        tile_m_eff = _round_up(_cdiv(M, 2), 8)
    M_pad = _round_up(M, tile_m_eff)
    if M_pad != M:
        x2d = jnp.pad(x2d, ((0, M_pad - M), (0, 0)))
    n_m = M_pad // tile_m_eff

    x2d = x2d.astype(compute_dtype)

    xi = jnp.dtype(compute_dtype).itemsize
    wi = jnp.dtype(compute_dtype).itemsize
    oi = jnp.dtype(x.dtype).itemsize
    if vmem_limit_bytes is None:
        vmem_bytes = (
            2 * tile_m_eff * D * xi                 # x blocks (double-buffered)
            + 2 * D * (2 * tile_h) * wi             # w13 blocks
            + 2 * tile_h * D * wi                   # w2 blocks
            + 2 * tile_m_eff * D * oi               # out blocks
            + tile_m_eff * D * 4                    # fp32 accumulator
            + 2 * tile_m_eff * (2 * tile_h) * 4     # fp32 ab + gated intermediates
        )
        vmem_limit_bytes = min(int(vmem_bytes * 1.5) + (4 << 20),
                               vmem_cap - (8 << 20))      # leave headroom
        vmem_limit_bytes = max(vmem_limit_bytes, 16 << 20)

    # Advisory cost hint for XLA's scheduler around the custom call.
    flops = 6 * M_pad * D * H
    bytes_accessed = (M_pad * D * (xi + oi)          # activations in/out
                      + n_m * (3 * H * D) * wi)      # weights re-streamed per M tile
    cost = pl.CostEstimate(flops=flops, transcendentals=M_pad * H,
                           bytes_accessed=bytes_accessed)

    out = pl.pallas_call(
        _swiglu_ffn_kernel,
        out_shape=jax.ShapeDtypeStruct((M_pad, D), x.dtype),
        grid_spec=pltpu.PrefetchScalarGridSpec(
            num_scalar_prefetch=0,
            grid=(n_m, n_h),
            in_specs=[
                pl.BlockSpec((tile_m_eff, D), lambda m, h: (m, 0)),           # x
                pl.BlockSpec((None, D, 2 * tile_h), lambda m, h: (h, 0, 0)),  # w1||w3
                pl.BlockSpec((None, tile_h, D), lambda m, h: (h, 0, 0)),      # w2
            ],
            out_specs=pl.BlockSpec((tile_m_eff, D), lambda m, h: (m, 0)),
            scratch_shapes=[pltpu.VMEM((tile_m_eff, D), jnp.float32)],
        ),
        compiler_params=pltpu.CompilerParams(
            dimension_semantics=("parallel", "arbitrary"),
            vmem_limit_bytes=vmem_limit_bytes,
        ),
        cost_estimate=cost,
    )(x2d, w13_blocks, w2_blocks)

    return out[:M].reshape(orig_shape)


# ---------------------------------------------------------------------------
# Reference / test harness
# ---------------------------------------------------------------------------
def _ffn_hidden_dim(dim, multiple_of, ffn_dim_multiplier=None):
    hidden_dim = int(dim * 8 / 3)
    if ffn_dim_multiplier is not None:
        hidden_dim = int(ffn_dim_multiplier * hidden_dim)
    return math.ceil(hidden_dim / multiple_of) * multiple_of


def _reference(x, w1, w3, w2):
    a = x @ w1
    b = x @ w3
    return ((a * jax.nn.sigmoid(a)) * b) @ w2


if __name__ == "__main__":
    # Small config consistent with the module (default multiple_of=256):
    # dim=256 -> hidden = ceil(256*8/3 / 256)*256 = 768
    dim = 256
    multiple_of = 256
    hidden = _ffn_hidden_dim(dim, multiple_of)          # 768

    batch, seq = 2, 8
    key = jax.random.PRNGKey(0)
    kx, k1, k2, k3 = jax.random.split(key, 4)

    x = jax.random.normal(kx, (batch, seq, dim), dtype=jnp.float32)
    # nn.Linear(dim, hidden).weight has shape (hidden, dim); we store the
    # transpose (dim, hidden) so the kernel does x @ W directly.
    w1 = jax.random.normal(k1, (dim, hidden), dtype=jnp.float32) * 0.02
    w3 = jax.random.normal(k3, (dim, hidden), dtype=jnp.float32) * 0.02
    w2 = jax.random.normal(k2, (hidden, dim), dtype=jnp.float32) * 0.02

    # One-time repack (weight-load time): bf16, block-contiguous.
    w13_blocks, w2_blocks = pack_ffn_weights(w1, w3, w2, tile_h=256,
                                             dtype=jnp.bfloat16)

    out = swiglu_ffn(x, w13_blocks, w2_blocks)
    out = jax.block_until_ready(out)

    # Reference on the same bf16-rounded operands (bf16 matmul inputs are
    # exact in fp32 accumulation; remaining delta = approx sigmoid + bf16
    # cast of the gated activation before the w2 matmul).
    f32 = lambda a: a.astype(jnp.bfloat16).astype(jnp.float32)
    ref = _reference(f32(x), f32(w1), f32(w3), f32(w2))

    assert out.shape == (batch, seq, dim)
    assert jnp.allclose(out, ref, atol=1e-2, rtol=1e-2), "mismatch vs reference"

    print("KERNEL_OK")
</pallas_src>

<mosaic_0001>
module attributes {stable_mosaic.version = 11 : i64} {
  func.func @_swiglu_ffn_kernel(%arg0: i32, %arg1: i32, %arg2: memref<16x256xbf16, #tpu.memory_space<vmem>>, %arg3: memref<1x256x512xbf16, #tpu.memory_space<vmem>>, %arg4: memref<1x256x256xbf16, #tpu.memory_space<vmem>>, %arg5: memref<16x256xf32, #tpu.memory_space<vmem>>, %arg6: memref<16x256xf32, #tpu.memory_space<vmem>>) attributes {dimension_semantics = [#tpu.dimension_semantics<parallel>, #tpu.dimension_semantics<arbitrary>], iteration_bounds = array<i64: 1, 3>, scalar_prefetch = 0 : i64, scratch_operands = 1 : i64, tpu.core_type = #tpu.core_type<tc>, window_params = [{transform_indices = @transform_0, window_bounds = array<i64: 16, 256>}, {transform_indices = @transform_1, window_bounds = array<i64: 1, 256, 512>}, {transform_indices = @transform_2, window_bounds = array<i64: 1, 256, 256>}, {transform_indices = @transform_3, window_bounds = array<i64: 16, 256>}]} {
    %c0_i32 = arith.constant 0 : i32
    %0 = arith.cmpi eq, %arg1, %c0_i32 : i32
    %1 = arith.extui %0 : i1 to i32
    %c0_i32_0 = arith.constant 0 : i32
    %2 = arith.cmpi ne, %1, %c0_i32_0 : i32
    scf.if %2 {
      %cst_16 = arith.constant 0.000000e+00 : f32
      %27 = vector.broadcast %cst_16 : f32 to vector<16x256xf32>
      %c0_17 = arith.constant 0 : index
      %c0_18 = arith.constant 0 : index
      %28 = vector.load %arg6[%c0_17, %c0_18] : memref<16x256xf32, #tpu.memory_space<vmem>>, vector<16x256xf32>
      tpu.vector_store %arg6[%c0_17, %c0_18], %27 {strides = array<i32>} : memref<16x256xf32, #tpu.memory_space<vmem>>, vector<16x256xf32>,
    } else {
    }
    %c0 = arith.constant 0 : index
    %c0_1 = arith.constant 0 : index
    %3 = vector.load %arg2[%c0, %c0_1] : memref<16x256xbf16, #tpu.memory_space<vmem>>, vector<16x256xbf16>
    %c0_2 = arith.constant 0 : index
    %c0_3 = arith.constant 0 : index
    %c0_4 = arith.constant 0 : index
    %4 = vector.load %arg3[%c0_2, %c0_3, %c0_4] : memref<1x256x512xbf16, #tpu.memory_space<vmem>>, vector<1x256x512xbf16>
    %5 = vector.shape_cast %4 : vector<1x256x512xbf16> to vector<256x512xbf16>
    %cst = arith.constant dense<0.000000e+00> : vector<16x512xf32>
    %6 = tpu.matmul %3, %5, %cst {dimension_numbers = #tpu.dot_dimension_numbers<[1], [0], [0], [1], [0, 0, 1, 1], [], []>} : vector<16x256xbf16>, vector<256x512xbf16>, vector<16x512xf32> -> vector<16x512xf32>
    %7 = vector.extract_strided_slice %6 {offsets = [0, 0], sizes = [16, 256], strides = [1, 1]} : vector<16x512xf32> to vector<16x256xf32>
    %8 = vector.extract_strided_slice %6 {offsets = [0, 256], sizes = [16, 256], strides = [1, 1]} : vector<16x512xf32> to vector<16x256xf32>
    %cst_5 = arith.constant 0.000000e+00 : f32
    %9 = vector.broadcast %cst_5 : f32 to vector<16x256xf32>
    %10 = arith.subf %9, %7 : vector<16x256xf32>
    %11 = math.exp %10 : vector<16x256xf32>
    %cst_6 = arith.constant 1.000000e+00 : f32
    %12 = vector.broadcast %cst_6 : f32 to vector<16x256xf32>
    %13 = arith.addf %12, %11 : vector<16x256xf32>
    %14 = tpu.reciprocal %13 {approx = true} : vector<16x256xf32> -> vector<16x256xf32>
    %15 = arith.mulf %7, %14 : vector<16x256xf32>
    %16 = arith.mulf %15, %8 : vector<16x256xf32>
    %c0_7 = arith.constant 0 : index
    %c0_8 = arith.constant 0 : index
    %17 = vector.load %arg6[%c0_7, %c0_8] : memref<16x256xf32, #tpu.memory_space<vmem>>, vector<16x256xf32>
    %18 = arith.truncf %16 : vector<16x256xf32> to vector<16x256xbf16>
    %c0_9 = arith.constant 0 : index
    %c0_10 = arith.constant 0 : index
    %c0_11 = arith.constant 0 : index
    %19 = vector.load %arg4[%c0_9, %c0_10, %c0_11] : memref<1x256x256xbf16, #tpu.memory_space<vmem>>, vector<1x256x256xbf16>
    %20 = vector.shape_cast %19 : vector<1x256x256xbf16> to vector<256x256xbf16>
    %cst_12 = arith.constant dense<0.000000e+00> : vector<16x256xf32>
    %21 = tpu.matmul %18, %20, %cst_12 {dimension_numbers = #tpu.dot_dimension_numbers<[1], [0], [0], [1], [0, 0, 1, 1], [], []>} : vector<16x256xbf16>, vector<256x256xbf16>, vector<16x256xf32> -> vector<16x256xf32>
    %22 = arith.addf %17, %21 : vector<16x256xf32>
    %c0_13 = arith.constant 0 : index
    %c0_14 = arith.constant 0 : index
    %23 = vector.load %arg6[%c0_13, %c0_14] : memref<16x256xf32, #tpu.memory_space<vmem>>, vector<16x256xf32>
    tpu.vector_store %arg6[%c0_13, %c0_14], %22 {strides = array<i32>} : memref<16x256xf32, #tpu.memory_space<vmem>>, vector<16x256xf32>,
    %c2_i32 = arith.constant 2 : i32
    %24 = arith.cmpi eq, %arg1, %c2_i32 : i32
    %25 = arith.extui %24 : i1 to i32
    %c0_i32_15 = arith.constant 0 : i32
    %26 = arith.cmpi ne, %25, %c0_i32_15 : i32
    scf.if %26 {
      %c0_16 = arith.constant 0 : index
      %c0_17 = arith.constant 0 : index
      %27 = vector.load %arg6[%c0_16, %c0_17] : memref<16x256xf32, #tpu.memory_space<vmem>>, vector<16x256xf32>
      %c0_18 = arith.constant 0 : index
      %c0_19 = arith.constant 0 : index
      %28 = vector.load %arg5[%c0_18, %c0_19] : memref<16x256xf32, #tpu.memory_space<vmem>>, vector<16x256xf32>
      tpu.vector_store %arg5[%c0_18, %c0_19], %27 {strides = array<i32>} : memref<16x256xf32, #tpu.memory_space<vmem>>, vector<16x256xf32>,
    } else {
    }
    return
  }
  func.func @transform_0(%arg0: i32, %arg1: i32) -> (i32, i32) {
    %c0_i32 = arith.constant 0 : i32
    %c0_i32_0 = arith.constant 0 : i32
    return %arg0, %c0_i32 : i32, i32
  }
  func.func @transform_1(%arg0: i32, %arg1: i32) -> (i32, i32, i32) {
    %c0_i32 = arith.constant 0 : i32
    %c0_i32_0 = arith.constant 0 : i32
    %c0_i32_1 = arith.constant 0 : i32
    return %arg1, %c0_i32, %c0_i32_0 : i32, i32, i32
  }
  func.func @transform_2(%arg0: i32, %arg1: i32) -> (i32, i32, i32) {
    %c0_i32 = arith.constant 0 : i32
    %c0_i32_0 = arith.constant 0 : i32
    %c0_i32_1 = arith.constant 0 : i32
    return %arg1, %c0_i32, %c0_i32_0 : i32, i32, i32
  }
  func.func @transform_3(%arg0: i32, %arg1: i32) -> (i32, i32) {
    %c0_i32 = arith.constant 0 : i32
    %c0_i32_0 = arith.constant 0 : i32
    return %arg0, %c0_i32 : i32, i32
  }
}

</mosaic_0001>

<bundles_post_ra>
// kernel: tpu_custom_call.1
= control target key start
LH: loop header
LB: loop body
LE: loop exit
PB: predicated region body
PF: predicated region fallthrough
CT: control target
= control target key end

     0   :  { %8 = vsyncpa [#allocation4], 0  ;;  %s2361_s0 = inlined_call_operand.hbm [shape: bf16[16,256], index: 0, kind: input, shape index: {}]   ;;  %s2362_s1 = inlined_call_operand.hbm [shape: bf16[3,256,512], index: 1, kind: input, shape index: {}]   ;;  %s2363_s2 = inlined_call_operand.hbm [shape: bf16[3,256,256], index: 2, kind: input, shape index: {}]   ;;  %s2364_s3 = inlined_call_operand.hbm [shape: f32[16,256], index: 3, kind: output, shape index: {}]  }
   0x1   :  { %9 = vsyncpa [#allocation7], 0 }
   0x2   :  { %11 = vsyncpa [#allocation7 + $0x1], 0 }
   0x3   :  { %12 = vsyncpa [#allocation5], 0  ;;  %s2011_s12 = smov 0   ;;  %s2013_s13 = smov 0  }
   0x4   :  { %s2015_s14 = smov 0   ;;  %s2017_s15 = smov 0  }
   0x5   :  { %s2019_s16 = smov 0   ;;  %s2021_s17 = smov 0  }
   0x6 LB: > { %s27_s18 = sadd.s32 1, %s1976_s16  ;;  %s63_s19 = sadd.s32 1, %s1968_s14  ;;  %s1980_s17 = sphi %s2021_s17, %s18_s17   ;;  %s1976_s16 = sphi %s2019_s16, %s2373_s16   ;;  %s1972_s15 = sphi %s2017_s15, %s2372_s15   ;;  %s1968_s14 = sphi %s2015_s14, %s2371_s14   ;;  %s1964_s13 = sphi %s2013_s13, %s2370_s13   ;;  %s1960_s12 = sphi %s2011_s12, %s2369_s12  }
   0x7   : > { %p28_p0 = scmp.ge.s32.totalorder %s27_s18, 3  ;;  %p70_p1 = scmp.ne.s32.totalorder %s1968_s14, %s1964_s13 }
   0x8   : > { %p71_p2 = scmp.eq.s32.totalorder %s1980_s17, 0  ;;  %p1727_p4 = scmp.lt.s32.totalorder %s1980_s17, 3 }
   0x9   : > { %s2375_s18 = smov (%p28_p0, %s27_s18), 0  ;;  %s170_s22 = sand.u32 1, %s1980_s17  }
   0xa   : > { %p2048_p3 = por %p71_p2, %p70_p1  ;;  %s60_s21 = ssub.s32 %s1976_s16, %s2375_s18 }
   0xb   : > { %p61_p5 = scmp.eq.s32.totalorder %s60_s21, 0  ;;  %s172_s23 = sand.u32 1, %s1968_s14  }
   0xc   : > { %s1603_s24 = sshll.u32 %s1976_s16, 9  ;;  %s1195_s26 = sshll.u32 %s172_s23, 9 }
   0xd   : > { %s2059_s25 = scalar_select %p61_p5, %s1968_s14, %s63_s19  }
   0xe   : > { %s179_s29 = scalar_lea.hbm %s2362_s1, %s1603_s24  ;;  %s174_s4 = scalar_lea.vmem [#allocation6], %s1195_s26 }
   0xf   : > { %s180_s30 = sshll.u32 %s179_s29, 4  ;;  %s182_s5 = sshll.u32 %s174_s4, 4  ;;  %s181_s30 = int_to_ptr.hbm [resolvable:$true] %s180_s30  ;;  %s183_s5 = int_to_ptr.vmem [resolvable:$true] %s182_s5 }
  0x10   : > { %p2068_p6 = pnand %p1727_p4, %p2048_p3  ;;  %s1198_s7 = sshll.u32 %s172_s23, 8 }
  0x11   : > { %s2072_s8 = scalar_lea.sflag [#allocation7], %s170_s22  ;;  %s1982_s9 = smov 256  }
  0x12   : > { %s1983_s10 = smov 16   ;;  %s196_s11 = scalar_lea.vmem [#allocation8], %s1198_s7 }
  0x13   : > { %1722 = dma.hbm_to_vmem [thread:$0]  (!%p2068_p6), %s181_s30, 8192, %s183_s5, %s2072_s8, %s1982_s9, %s1982_s9, %s1983_s10  }
  0x14   : > { %s204_s19 = sshll.u32 %s196_s11, 4  ;;  %s2078_s21 = sadd.s32 4294967295, %s1980_s17   ;;  %s205_s19 = int_to_ptr.vmem [resolvable:$true] %s204_s19 }
  0x15   : > { %p76_p7 = scmp.ne.s32.totalorder %s1964_s13, %s1960_s12  ;;  %p77_p8 = scmp.eq.s32.totalorder %s2078_s21, 0 }
  0x16   : > { %p1192_p9 = scmp.ge.s32.totalorder %s1980_s17, 1  ;;  %p139_p10 = scmp.lt.s32.totalorder %s1980_s17, 4 }
  0x17   : > { %p2087_p11 = por %p77_p8, %p76_p7  ;;  %s154_s24 = sshll.u32 %s2361_s0, 4  ;;  %s155_s24 = int_to_ptr.hbm [resolvable:$true] %s154_s24 }
  0x18   : > { %p2094_p12 = pnand %p1192_p9, %p139_p10  ;;  %s1984_s12 = smov [#allocation3]  }
  0x19   : > { %s156_s27 = sshll.u32 %s1984_s12, 4  ;;  %s1604_s28 = sshll.u32 %s1976_s16, 8  ;;  %s157_s27 = int_to_ptr.vmem [resolvable:$true] %s156_s27 }
  0x1a   : > { %p1715_p13 = pneg %p2094_p12  ;;  %s201_s4 = scalar_lea.hbm %s2363_s2, %s1604_s28 }
  0x1b   : > { %s202_s5 = sshll.u32 %s201_s4, 4  ;;  %s1985_s7 = smov 128   ;;  %s203_s5 = int_to_ptr.hbm [resolvable:$true] %s202_s5 }
  0x1c   : > { %p1716_p0 = pnand %p1715_p13, %p77_p8  ;;  %s1986_s9 = smov 8  }
  0x1d   : > { %1725 = dma.hbm_to_vmem [thread:$0]  (!%p2068_p6), %s203_s5, 4096, %s205_s19, %s2072_s8, %s1985_s7, %s1985_s7, %s1986_s9  }
  0x1e   : > { %1718 = dma.hbm_to_vmem [thread:$0]  (!%p1716_p0), %s155_s24, 256, %s157_s27, [#allocation4], %s1985_s7, %s1985_s7, %s1986_s9  }
  0x1f   : > { %216 = sbr.rel (%p2094_p12) target bundleno = 426 (0x1aa), region = 32 }
  0x24   : > { %1947 = dma.done.wait (%p77_p8), [#allocation4], 256  }
  0x25   : > { %1949 = vsyncadd (%p77_p8), [#allocation4], 4294967040  ;;  %s223_s10 = sand.u32 1, %s2078_s21   ;;  %s225_s11 = sand.u32 1, %s1964_s13  }
  0x26   : > { %s1203_s22 = sshll.u32 %s225_s11, 9  ;;  %s224_s23 = scalar_lea.sflag [#allocation7], %s223_s10 }
  0x27   : > { %s2117_s24 = scalar_lea.vmem [#allocation6], %s1203_s22 }
  0x28   : > { %1951 = dma.done.wait (%p2087_p11), %s224_s23, 12288  }
  0x29   : > { %1953 = vsyncadd (%p2087_p11), %s224_s23, 4294955008  ;;  %s1204_s6 = sshll.u32 %s225_s11, 8  ;;  %p1205_p1 = scmp.ne.s32.totalorder %s1972_s15, 0 }
  0x2a   : > { %s2123_s8 = scalar_lea.vmem [#allocation8], %s1204_s6 }
  0x2b   : > { %266 = sbr.rel (%p1205_p1) target bundleno = 53 (0x35), region = 48 }
  0x30   : > { %v1987_v0 = vmov 0.0  }
  0x31   : > { %267 = vst [vmem:[#allocation2 + $0x10] sm:$0xff] %v1987_v0 }
  0x32   : > { %268 = vst [vmem:[#allocation2] sm:$0xff] %v1987_v0 }
  0x33   : > { %269 = vst [vmem:[#allocation2 + $0x18] sm:$0xff] %v1987_v0 }
  0x34   : > { %270 = vst [vmem:[#allocation2 + $0x8] sm:$0xff] %v1987_v0 }
  0x35 PF: > { %v1328_v1 = vld [vmem:[%s2117_s24 + $0xe0] sm:$0xf]  ;;  %v1637_v2 = vld [vmem:[%s2117_s24 + $0xec] sm:$0xf0]  ;;  %v1635_v6 = vld [vmem:[%s2117_s24 + $0xe4] sm:$0xf] }
  0x36   : > { %v1456_v3 = vld [vmem:[%s2117_s24 + $0x1e0] sm:$0xf]  ;;  %v1329_v4 = vor.u32 %v1637_v2, %v1328_v1  ;;  %v1669_v5 = vld [vmem:[%s2117_s24 + $0x1ec] sm:$0xf0]  ;;  %v1330_v7 = vld [vmem:[%s2117_s24 + $0xf0] sm:$0xf0] }
  0x37   : > { %v1457_v8 = vor.u32 %v1669_v5, %v1456_v3  ;;  %v1333_v9 = vor.u32 %v1635_v6, %v1330_v7  ;;  %v1667_v10 = vld [vmem:[%s2117_s24 + $0x1e4] sm:$0xf]  ;;  %v1458_v11 = vld [vmem:[%s2117_s24 + $0x1f0] sm:$0xf0]  ;;  %v1312_v12 = vld [vmem:[%s2117_s24 + $0xc0] sm:$0xf] }
  0x38   : > { %667 = vmatpush.bf16.msra.mxu0 %v1329_v4  ;;  %v1461_v13 = vor.u32 %v1667_v10, %v1458_v11  ;;  %v1633_v14 = vld [vmem:[%s2117_s24 + $0xcc] sm:$0xf0]  ;;  %v1440_v15 = vld [vmem:[%s2117_s24 + $0x1c0] sm:$0xf]  ;;  %v1631_v19 = vld [vmem:[%s2117_s24 + $0xc4] sm:$0xf] }
  0x39   : > { %v1665_v16 = vld [vmem:[%s2117_s24 + $0x1cc] sm:$0xf0]  ;;  %681 = vmatpush.bf16.msra.mxu1 %v1457_v8  ;;  %695 = vmatpush.bf16.msra.mxu2 %v1333_v9  ;;  %v1313_v17 = vor.u32 %v1633_v14, %v1312_v12  ;;  %v1314_v20 = vld [vmem:[%s2117_s24 + $0xd0] sm:$0xf0]  ;;  %v1663_v21 = vld [vmem:[%s2117_s24 + $0x1c4] sm:$0xf] }
  0x3a   : > { %v1441_v18 = vor.u32 %v1665_v16, %v1440_v15  ;;  %709 = vmatpush.bf16.msra.mxu3 %v1461_v13  ;;  %v1317_v22 = vor.u32 %v1631_v19, %v1314_v20  ;;  %v1442_v23 = vld [vmem:[%s2117_s24 + $0x1d0] sm:$0xf0]  ;;  %v1296_v24 = vld [vmem:[%s2117_s24 + $0xa0] sm:$0xf]  ;;  %v1629_v25 = vld [vmem:[%s2117_s24 + $0xac] sm:$0xf0] }
  0x3b   : > { %v1445_v26 = vor.u32 %v1663_v21, %v1442_v23  ;;  %v1424_v27 = vld [vmem:[%s2117_s24 + $0x1a0] sm:$0xf]  ;;  %v1661_v28 = vld [vmem:[%s2117_s24 + $0x1ac] sm:$0xf0]  ;;  %v1627_v29 = vld [vmem:[%s2117_s24 + $0xa4] sm:$0xf]  ;;  %v1297_v30 = vor.u32 %v1629_v25, %v1296_v24 }
  0x3c   : > { %668 = vmatpush.bf16.msra.mxu0 %v1313_v17  ;;  %v1298_v31 = vld [vmem:[%s2117_s24 + $0xb0] sm:$0xf0]  ;;  %v1659_v32 = vld [vmem:[%s2117_s24 + $0x1a4] sm:$0xf]  ;;  %v1425_v34 = vor.u32 %v1661_v28, %v1424_v27  ;;  %v1280_v36 = vld [vmem:[%s2117_s24 + $0x80] sm:$0xf] }
  0x3d   : > { %v1426_v33 = vld [vmem:[%s2117_s24 + $0x1b0] sm:$0xf0]  ;;  %682 = vmatpush.bf16.msra.mxu1 %v1441_v18  ;;  %696 = vmatpush.bf16.msra.mxu2 %v1317_v22  ;;  %v1301_v35 = vor.u32 %v1627_v29, %v1298_v31  ;;  %v1625_v37 = vld [vmem:[%s2117_s24 + $0x8c] sm:$0xf0]  ;;  %v1408_v38 = vld [vmem:[%s2117_s24 + $0x180] sm:$0xf] }
  0x3e   : > { %710 = vmatpush.bf16.msra.mxu3 %v1445_v26  ;;  %v1429_v39 = vor.u32 %v1659_v32, %v1426_v33  ;;  %v1657_v40 = vld [vmem:[%s2117_s24 + $0x18c] sm:$0xf0]  ;;  %v1623_v41 = vld [vmem:[%s2117_s24 + $0x84] sm:$0xf]  ;;  %v1282_v42 = vld [vmem:[%s2117_s24 + $0x90] sm:$0xf0]  ;;  %v1281_v45 = vor.u32 %v1625_v37, %v1280_v36 }
  0x3f   : > { %v1655_v43 = vld [vmem:[%s2117_s24 + $0x184] sm:$0xf]  ;;  %v1410_v44 = vld [vmem:[%s2117_s24 + $0x190] sm:$0xf0]  ;;  %v1409_v46 = vor.u32 %v1657_v40, %v1408_v38  ;;  %v1285_v47 = vor.u32 %v1623_v41, %v1282_v42  ;;  %v1264_v48 = vld [vmem:[%s2117_s24 + $0x60] sm:$0xf] }
  0x40   : > { %669 = vmatpush.bf16.msra.mxu0 %v1297_v30  ;;  %v1621_v49 = vld [vmem:[%s2117_s24 + $0x6c] sm:$0xf0]  ;;  %v1392_v50 = vld [vmem:[%s2117_s24 + $0x160] sm:$0xf]  ;;  %v1413_v51 = vor.u32 %v1655_v43, %v1410_v44  ;;  %v1619_v53 = vld [vmem:[%s2117_s24 + $0x64] sm:$0xf] }
  0x41   : > { %683 = vmatpush.bf16.msra.mxu1 %v1425_v34  ;;  %697 = vmatpush.bf16.msra.mxu2 %v1301_v35  ;;  %v1653_v52 = vld [vmem:[%s2117_s24 + $0x16c] sm:$0xf0]  ;;  %v1266_v54 = vld [vmem:[%s2117_s24 + $0x70] sm:$0xf0]  ;;  %v1651_v55 = vld [vmem:[%s2117_s24 + $0x164] sm:$0xf]  ;;  %v1265_v57 = vor.u32 %v1621_v49, %v1264_v48 }
  0x42   : > { %711 = vmatpush.bf16.msra.mxu3 %v1429_v39  ;;  %v1394_v56 = vld [vmem:[%s2117_s24 + $0x170] sm:$0xf0]  ;;  %v1393_v58 = vor.u32 %v1653_v52, %v1392_v50  ;;  %v1269_v59 = vor.u32 %v1619_v53, %v1266_v54  ;;  %v1248_v60 = vld [vmem:[%s2117_s24 + $0x40] sm:$0xf]  ;;  %v1617_v61 = vld [vmem:[%s2117_s24 + $0x4c] sm:$0xf0] }
  0x43   : > { %v1376_v62 = vld [vmem:[%s2117_s24 + $0x140] sm:$0xf]  ;;  %v1397_v63 = vor.u32 %v1651_v55, %v1394_v56  ;;  %v1649_v0 = vld [vmem:[%s2117_s24 + $0x14c] sm:$0xf0]  ;;  %v1615_v1 = vld [vmem:[%s2117_s24 + $0x44] sm:$0xf]  ;;  %v1249_v5 = vor.u32 %v1617_v61, %v1248_v60 }
  0x44   : > { %670 = vmatpush.bf16.msra.mxu0 %v1281_v45  ;;  %v1250_v2 = vld [vmem:[%s2117_s24 + $0x50] sm:$0xf0]  ;;  %v1647_v3 = vld [vmem:[%s2117_s24 + $0x144] sm:$0xf]  ;;  %v1377_v6 = vor.u32 %v1649_v0, %v1376_v62  ;;  %v1232_v8 = vld [vmem:[%s2117_s24 + $0x20] sm:$0xf] }
  0x45   : > { %684 = vmatpush.bf16.msra.mxu1 %v1409_v46  ;;  %698 = vmatpush.bf16.msra.mxu2 %v1285_v47  ;;  %v1378_v4 = vld [vmem:[%s2117_s24 + $0x150] sm:$0xf0]  ;;  %v1253_v7 = vor.u32 %v1615_v1, %v1250_v2  ;;  %v1613_v9 = vld [vmem:[%s2117_s24 + $0x2c] sm:$0xf0]  ;;  %v1360_v10 = vld [vmem:[%s2117_s24 + $0x120] sm:$0xf] }
  0x46   : > { %712 = vmatpush.bf16.msra.mxu3 %v1413_v51  ;;  %v1381_v11 = vor.u32 %v1647_v3, %v1378_v4  ;;  %v1645_v12 = vld [vmem:[%s2117_s24 + $0x12c] sm:$0xf0]  ;;  %v1611_v13 = vld [vmem:[%s2117_s24 + $0x24] sm:$0xf]  ;;  %v1234_v14 = vld [vmem:[%s2117_s24 + $0x30] sm:$0xf0]  ;;  %v1233_v17 = vor.u32 %v1613_v9, %v1232_v8 }
  0x47   : > { %v1643_v15 = vld [vmem:[%s2117_s24 + $0x124] sm:$0xf]  ;;  %v1362_v16 = vld [vmem:[%s2117_s24 + $0x130] sm:$0xf0]  ;;  %v1216_v18 = vld [vmem:[%s2117_s24] sm:$0xf]  ;;  %v1361_v21 = vor.u32 %v1645_v12, %v1360_v10  ;;  %v1237_v22 = vor.u32 %v1611_v13, %v1234_v14 }
  0x48   : > { %671 = vmatpush.bf16.msra.mxu0 %v1265_v57  ;;  %v1609_v19 = vld [vmem:[%s2117_s24 + $0xc] sm:$0xf0]  ;;  %v1344_v20 = vld [vmem:[%s2117_s24 + $0x100] sm:$0xf]  ;;  %v1607_v24 = vld [vmem:[%s2117_s24 + $0x4] sm:$0xf]  ;;  %v1365_v26 = vor.u32 %v1643_v15, %v1362_v16 }
  0x49   : > { %685 = vmatpush.bf16.msra.mxu1 %v1393_v58  ;;  %699 = vmatpush.bf16.msra.mxu2 %v1269_v59  ;;  %v1641_v23 = vld [vmem:[%s2117_s24 + $0x10c] sm:$0xf0]  ;;  %v1218_v25 = vld [vmem:[%s2117_s24 + $0x10] sm:$0xf0]  ;;  %v1639_v27 = vld [vmem:[%s2117_s24 + $0x104] sm:$0xf]  ;;  %v1217_v33 = vor.u32 %v1609_v19, %v1216_v18 }
  0x4a   : > { %713 = vmatpush.bf16.msra.mxu3 %v1397_v63  ;;  %v1346_v28 = vld [vmem:[%s2117_s24 + $0x110] sm:$0xf0]  ;;  %v1336_v29 = vld [vmem:[%s2117_s24 + $0xe8] sm:$0xf]  ;;  %v1638_v30 = vld [vmem:[%s2117_s24 + $0xf4] sm:$0xf0]  ;;  %v1345_v37 = vor.u32 %v1641_v23, %v1344_v20  ;;  %v1221_v38 = vor.u32 %v1607_v24, %v1218_v25 }
  0x4b   : > { %v1464_v31 = vld [vmem:[%s2117_s24 + $0x1e8] sm:$0xf]  ;;  %v1670_v32 = vld [vmem:[%s2117_s24 + $0x1f4] sm:$0xf0]  ;;  %v1636_v34 = vld [vmem:[%s2117_s24 + $0xec] sm:$0xf]  ;;  %v1349_v42 = vor.u32 %v1639_v27, %v1346_v28  ;;  %v1337_v43 = vor.u32 %v1638_v30, %v1336_v29 }
  0x4c   : > { %672 = vmatpush.bf16.msra.mxu0 %v1249_v5  ;;  %v1338_v35 = vld [vmem:[%s2117_s24 + $0xf8] sm:$0xf0]  ;;  %v1668_v36 = vld [vmem:[%s2117_s24 + $0x1ec] sm:$0xf]  ;;  %v1208_v40 = vld [vmem:[#allocation3] sm:$0xf]  ;;  %v1465_v46 = vor.u32 %v1670_v32, %v1464_v31 }
  0x4d   : > { %686 = vmatpush.bf16.msra.mxu1 %v1377_v6  ;;  %700 = vmatpush.bf16.msra.mxu2 %v1253_v7  ;;  %v1466_v39 = vld [vmem:[%s2117_s24 + $0x1f8] sm:$0xf0]  ;;  %v1606_v41 = vld [vmem:[#allocation3 + $0x4] sm:$0xf0]  ;;  %v1605_v44 = vld [vmem:[#allocation3 + $0x4] sm:$0xf]  ;;  %v1341_v47 = vor.u32 %v1636_v34, %v1338_v35 }
  0x4e   : > { %714 = vmatpush.bf16.msra.mxu3 %v1381_v11  ;;  %v1210_v45 = vld [vmem:[#allocation3 + $0x8] sm:$0xf0]  ;;  %v1320_v48 = vld [vmem:[%s2117_s24 + $0xc8] sm:$0xf]  ;;  %v1634_v49 = vld [vmem:[%s2117_s24 + $0xd4] sm:$0xf0]  ;;  %v1469_v51 = vor.u32 %v1668_v36, %v1466_v39  ;;  %v2201_v52 = vor.u32 %v1606_v41, %v1208_v40 }
  0x4f   : > { %v1448_v50 = vld [vmem:[%s2117_s24 + $0x1c8] sm:$0xf]  ;;  %v1666_v53 = vld [vmem:[%s2117_s24 + $0x1d4] sm:$0xf0]  ;;  %v1632_v54 = vld [vmem:[%s2117_s24 + $0xcc] sm:$0xf]  ;;  %v2206_v56 = vor.u32 %v1605_v44, %v1210_v45  ;;  %v1321_v59 = vor.u32 %v1634_v49, %v1320_v48 }
  0x50   : > { %673 = vmatpush.bf16.msra.mxu0 %v1233_v17  ;;  %v1322_v55 = vld [vmem:[%s2117_s24 + $0xd8] sm:$0xf0]  ;;  %v1664_v57 = vld [vmem:[%s2117_s24 + $0x1cc] sm:$0xf]  ;;  %v1449_v60 = vor.u32 %v1666_v53, %v1448_v50  ;;  %v1304_v62 = vld [vmem:[%s2117_s24 + $0xa8] sm:$0xf] }
  0x51   : > { %687 = vmatpush.bf16.msra.mxu1 %v1361_v21  ;;  %701 = vmatpush.bf16.msra.mxu2 %v1237_v22  ;;  %v1450_v58 = vld [vmem:[%s2117_s24 + $0x1d8] sm:$0xf0]  ;;  %v1325_v61 = vor.u32 %v1632_v54, %v1322_v55  ;;  %v1630_v63 = vld [vmem:[%s2117_s24 + $0xb4] sm:$0xf0]  ;;  %v1432_v0 = vld [vmem:[%s2117_s24 + $0x1a8] sm:$0xf] }
  0x52   : > { %715 = vmatpush.bf16.msra.mxu3 %v1365_v26  ;;  %v1453_v1 = vor.u32 %v1664_v57, %v1450_v58  ;;  %v1662_v2 = vld [vmem:[%s2117_s24 + $0x1b4] sm:$0xf0]  ;;  %v1628_v3 = vld [vmem:[%s2117_s24 + $0xac] sm:$0xf]  ;;  %v1306_v4 = vld [vmem:[%s2117_s24 + $0xb8] sm:$0xf0]  ;;  %v1305_v7 = vor.u32 %v1630_v63, %v1304_v62 }
  0x53   : > { %v1660_v5 = vld [vmem:[%s2117_s24 + $0x1ac] sm:$0xf]  ;;  %v1434_v6 = vld [vmem:[%s2117_s24 + $0x1b8] sm:$0xf0]  ;;  %v1433_v8 = vor.u32 %v1662_v2, %v1432_v0  ;;  %v1309_v9 = vor.u32 %v1628_v3, %v1306_v4  ;;  %v1288_v10 = vld [vmem:[%s2117_s24 + $0x88] sm:$0xf] }
  0x54   : > { %674 = vmatpush.bf16.msra.mxu0 %v1217_v33  ;;  %v1626_v11 = vld [vmem:[%s2117_s24 + $0x94] sm:$0xf0]  ;;  %v1416_v12 = vld [vmem:[%s2117_s24 + $0x188] sm:$0xf]  ;;  %v1437_v13 = vor.u32 %v1660_v5, %v1434_v6  ;;  %v1624_v15 = vld [vmem:[%s2117_s24 + $0x8c] sm:$0xf] }
  0x55   : > { %688 = vmatpush.bf16.msra.mxu1 %v1345_v37  ;;  %702 = vmatpush.bf16.msra.mxu2 %v1221_v38  ;;  %v1658_v14 = vld [vmem:[%s2117_s24 + $0x194] sm:$0xf0]  ;;  %v1290_v16 = vld [vmem:[%s2117_s24 + $0x98] sm:$0xf0]  ;;  %v1656_v17 = vld [vmem:[%s2117_s24 + $0x18c] sm:$0xf]  ;;  %v1289_v19 = vor.u32 %v1626_v11, %v1288_v10 }
  0x56   : > { %716 = vmatpush.bf16.msra.mxu3 %v1349_v42  ;;  %v1418_v18 = vld [vmem:[%s2117_s24 + $0x198] sm:$0xf0]  ;;  %v1417_v20 = vor.u32 %v1658_v14, %v1416_v12  ;;  %v1293_v21 = vor.u32 %v1624_v15, %v1290_v16  ;;  %v1272_v22 = vld [vmem:[%s2117_s24 + $0x68] sm:$0xf]  ;;  %v1622_v23 = vld [vmem:[%s2117_s24 + $0x74] sm:$0xf0] }
  0x57   : > { %675 = vmatmul.bf16.vlgmr.msra.gmra.mxu0 %v2201_v52  ;;  %v1400_v24 = vld [vmem:[%s2117_s24 + $0x168] sm:$0xf]  ;;  %v1421_v25 = vor.u32 %v1656_v17, %v1418_v18  ;;  %v1654_v26 = vld [vmem:[%s2117_s24 + $0x174] sm:$0xf0]  ;;  %v1620_v27 = vld [vmem:[%s2117_s24 + $0x6c] sm:$0xf]  ;;  %v1273_v31 = vor.u32 %v1622_v23, %v1272_v22 }
  0x58   : > { %723 = vmatpush.bf16.msrb.mxu0 %v1337_v43  ;;  %689 = vmatmul.bf16.vlgmr.msra.gmra.mxu1 %v2206_v56  ;;  %v1274_v28 = vld [vmem:[%s2117_s24 + $0x78] sm:$0xf0]  ;;  %v1652_v29 = vld [vmem:[%s2117_s24 + $0x16c] sm:$0xf]  ;;  %v1401_v32 = vor.u32 %v1654_v26, %v1400_v24  ;;  %v1256_v34 = vld [vmem:[%s2117_s24 + $0x48] sm:$0xf] }
  0x59   : > { %737 = vmatpush.bf16.msrb.mxu1 %v1465_v46  ;;  %751 = vmatpush.bf16.msrb.mxu2 %v1341_v47  ;;  %v1402_v30 = vld [vmem:[%s2117_s24 + $0x178] sm:$0xf0]  ;;  %v1277_v33 = vor.u32 %v1620_v27, %v1274_v28  ;;  %v1618_v35 = vld [vmem:[%s2117_s24 + $0x54] sm:$0xf0]  ;;  %v1384_v36 = vld [vmem:[%s2117_s24 + $0x148] sm:$0xf] }
  0x5a   : > { %765 = vmatpush.bf16.msrb.mxu3 %v1469_v51  ;;  %703 = vmatmul.bf16.vlgmr.msra.gmra.mxu2 %v2201_v52  ;;  %v1405_v37 = vor.u32 %v1652_v29, %v1402_v30  ;;  %v1650_v38 = vld [vmem:[%s2117_s24 + $0x154] sm:$0xf0]  ;;  %v1616_v39 = vld [vmem:[%s2117_s24 + $0x4c] sm:$0xf]  ;;  %v1258_v40 = vld [vmem:[%s2117_s24 + $0x58] sm:$0xf0]  ;;  %v1257_v43 = vor.u32 %v1618_v35, %v1256_v34 }
  0x5b   : > { %717 = vmatmul.bf16.vlgmr.msra.gmra.mxu3 %v2206_v56  ;;  %v1648_v41 = vld [vmem:[%s2117_s24 + $0x14c] sm:$0xf]  ;;  %v1386_v42 = vld [vmem:[%s2117_s24 + $0x158] sm:$0xf0]  ;;  %v1385_v44 = vor.u32 %v1650_v38, %v1384_v36  ;;  %v1261_v45 = vor.u32 %v1616_v39, %v1258_v40  ;;  %v1240_v46 = vld [vmem:[%s2117_s24 + $0x28] sm:$0xf] }
  0x5c   : > { %724 = vmatpush.bf16.msrb.mxu0 %v1321_v59  ;;  %v1614_v47 = vld [vmem:[%s2117_s24 + $0x34] sm:$0xf0]  ;;  %v1368_v48 = vld [vmem:[%s2117_s24 + $0x128] sm:$0xf]  ;;  %v1389_v49 = vor.u32 %v1648_v41, %v1386_v42  ;;  %v1612_v51 = vld [vmem:[%s2117_s24 + $0x2c] sm:$0xf] }
  0x5d   : > { %738 = vmatpush.bf16.msrb.mxu1 %v1449_v60  ;;  %752 = vmatpush.bf16.msrb.mxu2 %v1325_v61  ;;  %v1646_v50 = vld [vmem:[%s2117_s24 + $0x134] sm:$0xf0]  ;;  %v1242_v53 = vld [vmem:[%s2117_s24 + $0x38] sm:$0xf0]  ;;  %v1644_v54 = vld [vmem:[%s2117_s24 + $0x12c] sm:$0xf]  ;;  %v1241_v57 = vor.u32 %v1614_v47, %v1240_v46 }
  0x5e   : > { %766 = vmatpush.bf16.msrb.mxu3 %v1453_v1  ;;  %v1370_v55 = vld [vmem:[%s2117_s24 + $0x138] sm:$0xf0]  ;;  %v1369_v58 = vor.u32 %v1646_v50, %v1368_v48  ;;  %v1245_v59 = vor.u32 %v1612_v51, %v1242_v53  ;;  %v1224_v60 = vld [vmem:[%s2117_s24 + $0x8] sm:$0xf]  ;;  %v1610_v61 = vld [vmem:[%s2117_s24 + $0x14] sm:$0xf0] }
  0x5f   : > { %v1352_v62 = vld [vmem:[%s2117_s24 + $0x108] sm:$0xf]  ;;  %v1373_v63 = vor.u32 %v1644_v54, %v1370_v55  ;;  %v1642_v0 = vld [vmem:[%s2117_s24 + $0x114] sm:$0xf0]  ;;  %v1608_v1 = vld [vmem:[%s2117_s24 + $0xc] sm:$0xf]  ;;  %v1225_v5 = vor.u32 %v1610_v61, %v1224_v60 }
  0x60   : > { %725 = vmatpush.bf16.msrb.mxu0 %v1305_v7  ;;  %v1226_v2 = vld [vmem:[%s2117_s24 + $0x18] sm:$0xf0]  ;;  %v1640_v3 = vld [vmem:[%s2117_s24 + $0x10c] sm:$0xf]  ;;  %v1353_v6 = vor.u32 %v1642_v0, %v1352_v62  ;;  %v1686_v10 = vld [vmem:[%s2123_s8 + $0x74] sm:$0xf0] }
  0x61   : > { %739 = vmatpush.bf16.msrb.mxu1 %v1433_v8  ;;  %753 = vmatpush.bf16.msrb.mxu2 %v1309_v9  ;;  %v1354_v4 = vld [vmem:[%s2117_s24 + $0x118] sm:$0xf0]  ;;  %v1229_v7 = vor.u32 %v1608_v1, %v1226_v2  ;;  %v1528_v9 = vld [vmem:[%s2123_s8 + $0x70] sm:$0xf]  ;;  %v1685_v11 = vld [vmem:[%s2123_s8 + $0x74] sm:$0xf] }
  0x62   : > { %767 = vmatpush.bf16.msrb.mxu3 %v1437_v13  ;;  %v1357_v8 = vor.u32 %v1640_v3, %v1354_v4  ;;  %v1529_v12 = vor.u32 %v1686_v10, %v1528_v9  ;;  %v1530_v13 = vld [vmem:[%s2123_s8 + $0x78] sm:$0xf0]  ;;  %v1520_v15 = vld [vmem:[%s2123_s8 + $0x60] sm:$0xf]  ;;  %v1684_v16 = vld [vmem:[%s2123_s8 + $0x64] sm:$0xf0] }
  0x63   : > { %v1533_v14 = vor.u32 %v1685_v11, %v1530_v13  ;;  %v1521_v17 = vor.u32 %v1684_v16, %v1520_v15  ;;  %v1594_v23 = vld [vmem:[%s2123_s8 + $0xf8] sm:$0xf0]  ;;  %v1682_v26 = vld [vmem:[%s2123_s8 + $0x54] sm:$0xf0]  ;;  %v1681_v27 = vld [vmem:[%s2123_s8 + $0x54] sm:$0xf] }
  0x64   : > { %726 = vmatpush.bf16.msrb.mxu0 %v1289_v19  ;;  %v1592_v19 = vld [vmem:[%s2123_s8 + $0xf0] sm:$0xf]  ;;  %v1514_v29 = vld [vmem:[%s2123_s8 + $0x58] sm:$0xf0]  ;;  %v1586_v35 = vld [vmem:[%s2123_s8 + $0xe8] sm:$0xf0] }
  0x65   : > { %740 = vmatpush.bf16.msrb.mxu1 %v1417_v20  ;;  %754 = vmatpush.bf16.msrb.mxu2 %v1293_v21  ;;  %v1702_v20 = vld [vmem:[%s2123_s8 + $0xf4] sm:$0xf0]  ;;  %v1701_v21 = vld [vmem:[%s2123_s8 + $0xf4] sm:$0xf]  ;;  %v1517_v30 = vor.u32 %v1681_v27, %v1514_v29  ;;  %v1680_v38 = vld [vmem:[%s2123_s8 + $0x44] sm:$0xf0] }
  0x66   : > { %768 = vmatpush.bf16.msrb.mxu3 %v1421_v25  ;;  %v1593_v22 = vor.u32 %v1702_v20, %v1592_v19  ;;  %v1597_v24 = vor.u32 %v1701_v21, %v1594_v23  ;;  %v1512_v25 = vld [vmem:[%s2123_s8 + $0x50] sm:$0xf]  ;;  %v1679_v39 = vld [vmem:[%s2123_s8 + $0x44] sm:$0xf]  ;;  %v1506_v41 = vld [vmem:[%s2123_s8 + $0x48] sm:$0xf0] }
  0x67   : > { %v1513_v28 = vor.u32 %v1682_v26, %v1512_v25  ;;  %v1509_v42 = vor.u32 %v1679_v39, %v1506_v41  ;;  %v1578_v47 = vld [vmem:[%s2123_s8 + $0xd8] sm:$0xf0]  ;;  %v1678_v50 = vld [vmem:[%s2123_s8 + $0x34] sm:$0xf0]  ;;  %v1677_v51 = vld [vmem:[%s2123_s8 + $0x34] sm:$0xf] }
  0x68   : > { %727 = vmatpush.bf16.msrb.mxu0 %v1273_v31  ;;  %v1584_v31 = vld [vmem:[%s2123_s8 + $0xe0] sm:$0xf]  ;;  %v1498_v54 = vld [vmem:[%s2123_s8 + $0x38] sm:$0xf0]  ;;  %v1570_v61 = vld [vmem:[%s2123_s8 + $0xc8] sm:$0xf0] }
  0x69   : > { %741 = vmatpush.bf16.msrb.mxu1 %v1401_v32  ;;  %755 = vmatpush.bf16.msrb.mxu2 %v1277_v33  ;;  %v1700_v32 = vld [vmem:[%s2123_s8 + $0xe4] sm:$0xf0]  ;;  %v1699_v33 = vld [vmem:[%s2123_s8 + $0xe4] sm:$0xf]  ;;  %v1501_v55 = vor.u32 %v1677_v51, %v1498_v54  ;;  %v1488_v0 = vld [vmem:[%s2123_s8 + $0x20] sm:$0xf] }
  0x6a   : > { %769 = vmatpush.bf16.msrb.mxu3 %v1405_v37  ;;  %v1585_v34 = vor.u32 %v1700_v32, %v1584_v31  ;;  %v1589_v36 = vor.u32 %v1699_v33, %v1586_v35  ;;  %v1504_v37 = vld [vmem:[%s2123_s8 + $0x40] sm:$0xf]  ;;  %v1676_v1 = vld [vmem:[%s2123_s8 + $0x24] sm:$0xf0]  ;;  %v1675_v2 = vld [vmem:[%s2123_s8 + $0x24] sm:$0xf] }
  0x6b   : > { %v1505_v40 = vor.u32 %v1680_v38, %v1504_v37  ;;  %v1489_v4 = vor.u32 %v1676_v1, %v1488_v0  ;;  %v1693_v9 = vld [vmem:[%s2123_s8 + $0xb4] sm:$0xf]  ;;  %v1674_v15 = vld [vmem:[%s2123_s8 + $0x14] sm:$0xf0]  ;;  %v1692_v19 = vld [vmem:[%s2123_s8 + $0xa4] sm:$0xf0] }
  0x6c   : > { %728 = vmatpush.bf16.msrb.mxu0 %v1257_v43  ;;  %v1576_v43 = vld [vmem:[%s2123_s8 + $0xd0] sm:$0xf]  ;;  %v1691_v23 = vld [vmem:[%s2123_s8 + $0xa4] sm:$0xf]  ;;  %v1672_v29 = vld [vmem:[%s2123_s8 + $0x4] sm:$0xf0] }
  0x6d   : > { %742 = vmatpush.bf16.msrb.mxu1 %v1385_v44  ;;  %756 = vmatpush.bf16.msrb.mxu2 %v1261_v45  ;;  %v1698_v44 = vld [vmem:[%s2123_s8 + $0xd4] sm:$0xf0]  ;;  %v1697_v45 = vld [vmem:[%s2123_s8 + $0xd4] sm:$0xf]  ;;  %v1474_v33 = vld [vmem:[%s2123_s8 + $0x8] sm:$0xf0] }
  0x6e   : > { %770 = vmatpush.bf16.msrb.mxu3 %v1389_v49  ;;  %v1577_v46 = vor.u32 %v1698_v44, %v1576_v43  ;;  %v1581_v48 = vor.u32 %v1697_v45, %v1578_v47  ;;  %v1496_v49 = vld [vmem:[%s2123_s8 + $0x30] sm:$0xf]  ;;  %v1690_v37 = vld [vmem:[%s2123_s8 + $0x94] sm:$0xf0]  ;;  %v1689_v38 = vld [vmem:[%s2123_s8 + $0x94] sm:$0xf] }
  0x6f   : > { %v1497_v53 = vor.u32 %v1678_v50, %v1496_v49  ;;  %v1546_v41 = vld [vmem:[%s2123_s8 + $0x98] sm:$0xf0]  ;;  %v1688_v47 = vld [vmem:[%s2123_s8 + $0x84] sm:$0xf0]  ;;  %v1687_v51 = vld [vmem:[%s2123_s8 + $0x84] sm:$0xf] }
  0x70   : > { %729 = vmatpush.bf16.msrb.mxu0 %v1241_v57  ;;  %v1568_v57 = vld [vmem:[%s2123_s8 + $0xc0] sm:$0xf]  ;;  %v1549_v44 = vor.u32 %v1689_v38, %v1546_v41  ;;  %p1598_p2 = scmp.ne.s32.totalorder %s1972_s15, 2 }
  0x71   : > { %743 = vmatpush.bf16.msrb.mxu1 %v1369_v58  ;;  %757 = vmatpush.bf16.msrb.mxu2 %v1245_v59  ;;  %v1696_v58 = vld [vmem:[%s2123_s8 + $0xc4] sm:$0xf0]  ;;  %v1695_v59 = vld [vmem:[%s2123_s8 + $0xc4] sm:$0xf] }
  0x72   : > { %771 = vmatpush.bf16.msrb.mxu3 %v1373_v63  ;;  %v1569_v60 = vor.u32 %v1696_v58, %v1568_v57  ;;  %v1573_v63 = vor.u32 %v1695_v59, %v1570_v61 }
  0x74   : > { %730 = vmatpush.bf16.msrb.mxu0 %v1225_v5  ;;  %v1490_v5 = vld [vmem:[%s2123_s8 + $0x28] sm:$0xf0] }
  0x75   : > { %744 = vmatpush.bf16.msrb.mxu1 %v1353_v6  ;;  %758 = vmatpush.bf16.msrb.mxu2 %v1229_v7  ;;  %v1493_v6 = vor.u32 %v1675_v2, %v1490_v5  ;;  %v1560_v7 = vld [vmem:[%s2123_s8 + $0xb0] sm:$0xf] }
  0x76   : > { %772 = vmatpush.bf16.msrb.mxu3 %v1357_v8  ;;  %v1694_v8 = vld [vmem:[%s2123_s8 + $0xb4] sm:$0xf0] }
  0x77   : > { %731 = vmatmul.bf16.vlgmr.msrb.gmra.mxu0 %v2201_v52  ;;  %v1561_v11 = vor.u32 %v1694_v8, %v1560_v7 }
  0x78   : > { %745 = vmatmul.bf16.vlgmr.msrb.gmra.mxu1 %v2206_v56  ;;  %759 = vmatmul.bf16.vlgmr.msrb.gmra.mxu2 %v2201_v52  ;;  %v1683_v52 = vld [vmem:[%s2123_s8 + $0x64] sm:$0xf] }
  0x79   : > { %773 = vmatmul.bf16.vlgmr.msrb.gmra.mxu3 %v2206_v56  ;;  %1005 = vmatpush.bf16.msra.mxu0 %v1529_v12  ;;  %v1522_v56 = vld [vmem:[%s2123_s8 + $0x68] sm:$0xf0]  ;;  %v1562_v12 = vld [vmem:[%s2123_s8 + $0xb8] sm:$0xf0] }
  0x7a   : > { %1033 = vmatpush.bf16.msra.mxu2 %v1533_v14  ;;  %v1525_v18 = vor.u32 %v1683_v52, %v1522_v56  ;;  %1019 = vmatpush.bf16.msra.mxu1 %v1593_v22  ;;  %v1565_v13 = vor.u32 %v1693_v9, %v1562_v12  ;;  %v1480_v14 = vld [vmem:[%s2123_s8 + $0x10] sm:$0xf]  ;;  %v1673_v52 = vld [vmem:[%s2123_s8 + $0x14] sm:$0xf] }
  0x7b   : > { %1047 = vmatpush.bf16.msra.mxu3 %v1597_v24  ;;  %v1481_v16 = vor.u32 %v1674_v15, %v1480_v14  ;;  %v1554_v24 = vld [vmem:[%s2123_s8 + $0xa8] sm:$0xf0] }
  0x7c   : > { %v1557_v27 = vor.u32 %v1691_v23, %v1554_v24 }
  0x7d   : > { %1006 = vmatpush.bf16.msra.mxu0 %v1521_v17  ;;  %v1482_v17 = vld [vmem:[%s2123_s8 + $0x18] sm:$0xf0] }
  0x7e   : > { %1034 = vmatpush.bf16.msra.mxu2 %v1525_v18  ;;  %1020 = vmatpush.bf16.msra.mxu1 %v1585_v34  ;;  %v1485_v56 = vor.u32 %v1673_v52, %v1482_v17  ;;  %v1552_v18 = vld [vmem:[%s2123_s8 + $0xa0] sm:$0xf] }
  0x7f   : > { %1048 = vmatpush.bf16.msra.mxu3 %v1589_v36  ;;  %v1553_v22 = vor.u32 %v1692_v19, %v1552_v18  ;;  %v1544_v36 = vld [vmem:[%s2123_s8 + $0x90] sm:$0xf] }
  0x81   : > { %1007 = vmatpush.bf16.msra.mxu0 %v1513_v28  ;;  %v1472_v28 = vld [vmem:[%s2123_s8] sm:$0xf] }
  0x82   : > { %1035 = vmatpush.bf16.msra.mxu2 %v1517_v30  ;;  %1021 = vmatpush.bf16.msra.mxu1 %v1577_v46  ;;  %v1671_v30 = vld [vmem:[%s2123_s8 + $0x4] sm:$0xf]  ;;  %v1473_v32 = vor.u32 %v1672_v29, %v1472_v28  ;;  %v1536_v46 = vld [vmem:[%s2123_s8 + $0x80] sm:$0xf] }
  0x83   : > { %1049 = vmatpush.bf16.msra.mxu3 %v1581_v48  ;;  %v1477_v35 = vor.u32 %v1671_v30, %v1474_v33  ;;  %v1537_v50 = vor.u32 %v1688_v47, %v1536_v46  ;;  %v807_v30 = vld [vmem:[#allocation2 + $0x10] sm:$0xff] }
  0x85   : > { %1008 = vmatpush.bf16.msra.mxu0 %v1505_v40  ;;  %v1545_v40 = vor.u32 %v1690_v37, %v1544_v36 }
  0x86   : > { %1036 = vmatpush.bf16.msra.mxu2 %v1509_v42  ;;  %1022 = vmatpush.bf16.msra.mxu1 %v1569_v60 }
  0x87   : > { %1050 = vmatpush.bf16.msra.mxu3 %v1573_v63 }
  0x89   : > { %1009 = vmatpush.bf16.msra.mxu0 %v1497_v53  ;;  %v1538_v53 = vld [vmem:[%s2123_s8 + $0x88] sm:$0xf0] }
  0x8a   : > { %1037 = vmatpush.bf16.msra.mxu2 %v1501_v55  ;;  %1023 = vmatpush.bf16.msra.mxu1 %v1561_v11  ;;  %v1541_v55 = vor.u32 %v1687_v51, %v1538_v53 }
  0x8b   : > { %1051 = vmatpush.bf16.msra.mxu3 %v1565_v13 }
  0x8d   : > { %1010 = vmatpush.bf16.msra.mxu0 %v1489_v4 }
  0x8e   : > { %1038 = vmatpush.bf16.msra.mxu2 %v1493_v6  ;;  %1024 = vmatpush.bf16.msra.mxu1 %v1553_v22 }
  0x8f   : > { %1052 = vmatpush.bf16.msra.mxu3 %v1557_v27 }
  0x91   : > { %1011 = vmatpush.bf16.msra.mxu0 %v1481_v16 }
  0x92   : > { %1039 = vmatpush.bf16.msra.mxu2 %v1485_v56  ;;  %1025 = vmatpush.bf16.msra.mxu1 %v1545_v40  ;;  %v809_v40 = vld [vmem:[#allocation2 + $0x18] sm:$0xff] }
  0x93   : > { %1053 = vmatpush.bf16.msra.mxu3 %v1549_v44 }
  0x95   : > { %1012 = vmatpush.bf16.msra.mxu0 %v1473_v32 }
  0x96   : > { %1040 = vmatpush.bf16.msra.mxu2 %v1477_v35  ;;  %1026 = vmatpush.bf16.msra.mxu1 %v1537_v50  ;;  %v808_v35 = vld [vmem:[#allocation2] sm:$0xff] }
  0x97   : > { %1054 = vmatpush.bf16.msra.mxu3 %v1541_v55 }
  0xd4   : > { %v676_v62 = vpop.f32.mrf.mxu0 }
  0xd5   : > { %v690_v3 = vpop.f32.mrf.mxu1 }
  0xd6   : > { %v2309_v10 = vadd.f32 %v690_v3, %v676_v62 }
  0xd8   : > { %v779_v20 = vsub.f32 0.0, %v2309_v10 }
  0xda   : > { %v783_v42 = vmul.f32 1.442695, %v779_v20 }
  0xdc   : > { %v678_v26 = vpop.f32.mrf.mxu0  ;;  %1788 = vpow2.f32 %v783_v42 }
  0xdd   : > { %v704_v21 = vpop.f32.mrf.mxu2  ;;  %v692_v31 = vpop.f32.mrf.mxu1 }
  0xde   : > { %v718_v25 = vpop.f32.mrf.mxu3  ;;  %v693_v34 = vadd.f32 %v692_v31, %v678_v26 }
  0xdf   : > { %v2328_v39 = vadd.f32 %v718_v25, %v704_v21 }
  0xe0   : > { %v781_v43 = vsub.f32 0.0, %v693_v34 }
  0xe1   : > { %v780_v48 = vsub.f32 0.0, %v2328_v39 }
  0xe2   : > { %v787_v45 = vmul.f32 1.442695, %v781_v43  ;;  %v1789_v61 = vpop.eup %1788 }
  0xe3   : > { %v785_v58 = vmul.f32 1.442695, %v780_v48  ;;  %v791_v63 = vadd.f32 1.0, %v1789_v61 }
  0xe4   : > { %1790 = vpow2.f32 %v787_v45  ;;  %v810_v45 = vld [vmem:[#allocation2 + $0x8] sm:$0xff] }
  0xe5   : > { %v706_v49 = vpop.f32.mrf.mxu2  ;;  %1792 = vpow2.f32 %v785_v58 }
  0xe6   : > { %v720_v54 = vpop.f32.mrf.mxu3 }
  0xe7   : > { %v721_v57 = vadd.f32 %v720_v54, %v706_v49 }
  0xe9   : > { %v782_v59 = vsub.f32 0.0, %v721_v57 }
  0xea   : > { %v1791_v62 = vpop.eup %1790 }
  0xeb   : > { %v789_v60 = vmul.f32 1.442695, %v782_v59  ;;  %v793_v0 = vadd.f32 1.0, %v1791_v62  ;;  %v1793_v1 = vpop.eup %1792 }
  0xec   : > { %v792_v5 = vadd.f32 1.0, %v1793_v1 }
  0xed   : > { %1794 = vpow2.f32 %v789_v60 }
  0xee   : > { %1796 = vrcp.f32 %v791_v63 }
  0xef   : > { %1798 = vrcp.f32 %v793_v0 }
  0xf0   : > { %1800 = vrcp.f32 %v792_v5 }
  0xf3   : > { %v1795_v3 = vpop.eup %1794 }
  0xf4   : > { %v732_v2 = vpop.f32.mrf.mxu0  ;;  %v794_v6 = vadd.f32 1.0, %v1795_v3  ;;  %v1797_v7 = vpop.eup %1796 }
  0xf5   : > { %v746_v4 = vpop.f32.mrf.mxu1  ;;  %v1799_v8 = vpop.eup %1798  ;;  %v799_v15 = vmul.f32 %v1797_v7, %v2309_v10 }
  0xf6   : > { %1802 = vrcp.f32 %v794_v6  ;;  %v747_v11 = vadd.f32 %v746_v4, %v732_v2  ;;  %v801_v16 = vmul.f32 %v1799_v8, %v693_v34  ;;  %v1801_v18 = vpop.eup %1800 }
  0xf7   : > { %v800_v24 = vmul.f32 %v1801_v18, %v2328_v39 }
  0xf8   : > { %v803_v17 = vmul.f32 %v799_v15, %v747_v11 }
  0xfb   : > { %v760_v9 = vpop.f32.mrf.mxu2 }
  0xfc   : > { %v774_v12 = vpop.f32.mrf.mxu3  ;;  %v734_v13 = vpop.f32.mrf.mxu0 }
  0xfd   : > { %v748_v14 = vpop.f32.mrf.mxu1  ;;  %v1803_v19 = vpop.eup %1802  ;;  %v775_v21 = vadd.f32 %v774_v12, %v760_v9 }
  0xfe   : > { %v749_v52 = vadd.f32 %v748_v14, %v734_v13  ;;  %v802_v25 = vmul.f32 %v1803_v19, %v721_v57 }
  0xff   : > { %v804_v27 = vmul.f32 %v800_v24, %v775_v21 }
 0x100   : > { %v805_v56 = vmul.f32 %v801_v16, %v749_v52 }
 0x102   : > { %v811_v20 = vpack.c.bf16 %v805_v56, %v803_v17 }
 0x103   : > { %v762_v22 = vpop.f32.mrf.mxu2 }
 0x104   : > { %v776_v23 = vpop.f32.mrf.mxu3  ;;  %1013 = vmatmul.bf16.vlgmr.msra.gmra.mxu0 %v811_v20  ;;  %1041 = vmatmul.bf16.vlgmr.msra.gmra.mxu2 %v811_v20 }
 0x105   : > { %v777_v26 = vadd.f32 %v776_v23, %v762_v22 }
 0x107   : > { %v806_v28 = vmul.f32 %v802_v25, %v777_v26 }
 0x109   : > { %v812_v29 = vpack.c.bf16 %v806_v28, %v804_v27 }
 0x10b   : > { %1027 = vmatmul.bf16.vlgmr.msra.gmra.mxu1 %v812_v29  ;;  %1055 = vmatmul.bf16.vlgmr.msra.gmra.mxu3 %v812_v29 }
 0x181   : > { %v1014_v10 = vpop.f32.mrf.mxu0 }
 0x187   : > { %v1042_v34 = vpop.f32.mrf.mxu2 }
 0x188   : > { %v1028_v31 = vpop.f32.mrf.mxu1 }
 0x189   : > { %v1029_v32 = vadd.f32 %v1028_v31, %v1014_v10  ;;  %v1016_v38 = vpop.f32.mrf.mxu0 }
 0x18b   : > { %v1061_v33 = vadd.f32 %v1029_v32, %v807_v30 }
 0x18d   : > { %1065 = vst [vmem:[#allocation2 + $0x10] sm:$0xff] %v1061_v33 }
 0x18e   : > { %v1056_v36 = vpop.f32.mrf.mxu3 }
 0x18f   : > { %v1057_v37 = vadd.f32 %v1056_v36, %v1042_v34  ;;  %v1044_v44 = vpop.f32.mrf.mxu2 }
 0x190   : > { %v1030_v39 = vpop.f32.mrf.mxu1 }
 0x191   : > { %v1062_v41 = vadd.f32 %v1057_v37, %v808_v35  ;;  %v1031_v42 = vadd.f32 %v1030_v39, %v1016_v38 }
 0x193   : > { %1066 = vst [vmem:[#allocation2] sm:$0xff] %v1062_v41  ;;  %v1063_v43 = vadd.f32 %v1031_v42, %v809_v40 }
 0x195   : > { %1067 = vst [vmem:[#allocation2 + $0x18] sm:$0xff] %v1063_v43 }
 0x196   : > { %v1058_v46 = vpop.f32.mrf.mxu3 }
 0x197   : > { %v1059_v47 = vadd.f32 %v1058_v46, %v1044_v44  ;;  %1072 = sbr.rel (%p1598_p2) target bundleno = 420 (0x1a4), region = 52 }
 0x199   : > { %v1064_v48 = vadd.f32 %v1059_v47, %v810_v45 }
 0x19b   : > { %1068 = vst [vmem:[#allocation2 + $0x8] sm:$0xff] %v1064_v48 }
 0x19c   : > { %v1073_v49 = vld [vmem:[#allocation2 + $0x10] sm:$0xff]  ;;  %v1074_v50 = vld [vmem:[#allocation2] sm:$0xff]  ;;  %v1075_v51 = vld [vmem:[#allocation2 + $0x18] sm:$0xff] }
 0x19d   : > { %1077 = vst [vmem:[#allocation9] sm:$0xff] %v1073_v49 }
 0x19e   : > { %1078 = vst [vmem:[#allocation9 + $0x8] sm:$0xff] %v1074_v50 }
 0x19f   : > { %1079 = vst [vmem:[#allocation9 + $0x10] sm:$0xff] %v1075_v51 }
 0x1a2   : > { %v1076_v53 = vld [vmem:[#allocation2 + $0x8] sm:$0xff] }
 0x1a3   : > { %1080 = vst [vmem:[#allocation9 + $0x18] sm:$0xff] %v1076_v53 }
 0x1a4 PF: > { %p1729_p3 = scmp.eq.s32.totalorder %s2078_s21, 2  ;;  %s1092_s26 = sshll.u32 %s2364_s3, 4  ;;  %s1093_s26 = int_to_ptr.hbm [resolvable:$true] %s1092_s26 }
 0x1a5   : > { %s1988_s12 = smov [#allocation9]   ;;  %s1989_s15 = smov 256  }
 0x1a6   : > { %s1090_s27 = sshll.u32 %s1988_s12, 4  ;;  %s1990_s28 = smov 16   ;;  %s1091_s27 = int_to_ptr.vmem [resolvable:$true] %s1090_s27 }
 0x1a7   : > { %1712 = dma.vmem_to_hbm [thread:$0]  (%p1729_p3), %s1091_s27, 512, %s1093_s26, [#allocation5], %s1989_s15, %s1989_s15, %s1990_s28  }
 0x1a8   : > { %1955 = dma.done.wait (%p1729_p3), [#allocation5], 512  }
 0x1a9   : > { %1957 = vsyncadd (%p1729_p3), [#allocation5], 4294966784 }
 0x1aa PF: > { %s18_s17 = sadd.s32 1, %s1980_s17   ;;  %s2369_s12 = smov %s1964_s13 }
 0x1ab   : > { %p15_p4 = scmp.ge.s32.totalorder %s18_s17, 5   ;;  %s2370_s13 = smov %s1968_s14 }
 0x1ac   : > { %s2371_s14 = smov %s2059_s25  ;;  %s2372_s15 = smov %s1976_s16 }
 0x1ad   : > { %s2373_s16 = smov %s2375_s18  ;;  %17 = sbr.rel (!%p15_p4) target bundleno = 6 (0x6), region = 95 }
 0x1b2   :  { %1109 = vsyncpa [#allocation4], 1 }
 0x1b3   :  { %1111 = vsyncpa [#allocation4 + $0x1], 1 }
 0x1b4   :  { %1112 = vsyncpa [#allocation7], 1 }
 0x1b5   :  { %1114 = vsyncpa [#allocation7 + $0x1], 1 }
 0x1b6   :  { %1115 = vsyncpa [#allocation5], 1 }
 0x1b7   :  { %1117 = vsyncpa [#allocation5 + $0x1], 1 }

</bundles_post_ra>
